<compile_context>
chip_gen: v7x
topology: tpu7x:2x2x1
jax: 0.10.0
libtpu: 0.0.40
codegen_flags: <defaults>
</compile_context>

<pallas_src>
import functools

import jax
import jax.numpy as jnp
from jax.experimental import pallas as pl
from jax.experimental.pallas import tpu as pltpu


def _layernorm_kernel(x_ref, scale_ref, shift_ref, o_ref, *, eps):
    # x_ref: (row_tile, D) block in VMEM; scale/shift: (1, D) in epilogue dtype.
    x = x_ref[...]
    xf = x.astype(jnp.float32)

    # Single-pass statistics in f32 (one fewer full-tile temp than two-pass).
    # Note: E[x^2] - mean^2 cancels only for |mean| >> std, which is not the
    # LayerNorm regime; clamp at 0 to keep rsqrt safe for constant rows.
    mean = jnp.mean(xf, axis=-1, keepdims=True)
    mean_sq = jnp.mean(xf * xf, axis=-1, keepdims=True)
    var = jnp.maximum(mean_sq - mean * mean, 0.0)
    inv_std = jax.lax.rsqrt(var + eps)          # EUP rsqrt, no divide

    # Elementwise epilogue in the param dtype (bf16 for bf16 inputs on
    # v6e/v7x, f32 otherwise); only (rows, 1) columns are cast, cheaply.
    ep_dtype = scale_ref.dtype
    xe = x.astype(ep_dtype)
    y = (xe - mean.astype(ep_dtype)) * inv_std.astype(ep_dtype)
    y = y * scale_ref[...] + shift_ref[...]
    o_ref[...] = y.astype(o_ref.dtype)


def _round_up(x, m):
    return ((x + m - 1) // m) * m


def _sublane_pack(itemsize):
    if itemsize >= 4:
        return 8
    if itemsize == 2:
        return 16
    return 32


def _vmem_capacity_bytes():
    # Best-effort hardware query; fall back to the smallest per-TC VMEM
    # (v7x: 64 MiB) so the budgets stay safe everywhere.
    try:
        cap = int(pltpu.get_tpu_info().vmem_capacity_bytes)
        if cap > 0:
            return cap
    except Exception:
        pass
    return 64 << 20


def _pick_row_tile(rows, d, itemsize, vmem_cap):
    pack = _sublane_pack(itemsize)
    d_pad = _round_up(d, 128)

    # Tiling budget ~ half the physical VMEM (64 MiB on v5e/v6e, 32 MiB on
    # v7x), leaving headroom for compiler-internal scratch.
    budget = min(vmem_cap // 2, 64 << 20)

    # Per-row working set: double-buffered input + output tiles (lane-padded)
    # plus ~4 full-tile f32 compute temporaries materialized by the body.
    per_row_bytes = 4 * d_pad * itemsize + 4 * d_pad * 4
    max_rows_by_vmem = max(pack, (budget // per_row_bytes) // pack * pack)

    # Bigger cap for small D so the ~0.35us per-step overhead amortizes.
    row_cap = 2048 if d <= 1024 else 1024

    # Keep >=2 grid steps when possible so both v7x TensorCores stream HBM.
    two_step_cap = max(pack, _round_up((rows + 1) // 2, pack))

    return max(pack, min(max_rows_by_vmem, row_cap, two_step_cap))


def layer_norm(x, scale, shift, eps=1e-5, row_tile=None):
    """LayerNorm over the last axis. x: [..., D]; scale, shift: [D]."""
    orig_shape = x.shape
    D = orig_shape[-1]
    rows = 1
    for s in orig_shape[:-1]:
        rows *= s
    x2 = x.reshape(rows, D)
    itemsize = x2.dtype.itemsize
    pack = _sublane_pack(itemsize)

    vmem_cap = _vmem_capacity_bytes()
    if row_tile is None:
        row_tile = _pick_row_tile(rows, D, itemsize, vmem_cap)
    else:
        row_tile = max(pack, _round_up(int(row_tile), pack))

    # Epilogue dtype: keep bf16/f16 inputs in their own dtype for the
    # elementwise tail (reductions stay f32); f32 otherwise.
    if jnp.issubdtype(x2.dtype, jnp.floating) and itemsize == 2:
        ep_dtype = x2.dtype
    else:
        ep_dtype = jnp.float32
    ep_itemsize = jnp.dtype(ep_dtype).itemsize

    # Grid-invariant params: cast once on the host, not per grid step.
    scale2 = scale.reshape(1, D).astype(ep_dtype)
    shift2 = shift.reshape(1, D).astype(ep_dtype)

    # Ragged last block is masked by Pallas; no host-side pad/slice needed.
    grid = (pl.cdiv(rows, row_tile),)

    # Scoped-VMEM budget: double-buffered in + out tiles (layout-padded with
    # the dtype's sublane pack) + ~4 full-tile f32 temps + params + slack,
    # capped below physical VMEM with 16 MiB headroom (=> 48 MiB on v7x).
    d_pad = _round_up(D, 128)
    rt_pad = _round_up(row_tile, pack)
    io_tile_bytes = rt_pad * d_pad * itemsize
    temp_bytes = 4 * rt_pad * d_pad * 4
    param_bytes = 2 * 2 * d_pad * ep_itemsize
    vmem_bytes = 2 * 2 * io_tile_bytes + temp_bytes + param_bytes + (2 << 20)
    vmem_cap_limit = max(32 << 20, vmem_cap - (16 << 20))
    vmem_bytes = int(min(max(vmem_bytes, 16 << 20), vmem_cap_limit))

    # Advisory cost hint so XLA can overlap this call with surrounding HLO.
    cost = pl.CostEstimate(
        flops=8 * rows * D,
        transcendentals=rows,
        bytes_accessed=2 * rows * D * itemsize + 2 * D * ep_itemsize,
    )

    kernel = functools.partial(_layernorm_kernel, eps=eps)

    out = pl.pallas_call(
        kernel,
        out_shape=jax.ShapeDtypeStruct((rows, D), x.dtype),
        grid_spec=pl.GridSpec(
            grid=grid,
            in_specs=[
                pl.BlockSpec((row_tile, D), lambda i: (i, 0)),
                pl.BlockSpec((1, D), lambda i: (0, 0)),
                pl.BlockSpec((1, D), lambda i: (0, 0)),
            ],
            out_specs=pl.BlockSpec((row_tile, D), lambda i: (i, 0)),
        ),
        compiler_params=pltpu.CompilerParams(
            dimension_semantics=("parallel",),
            vmem_limit_bytes=vmem_bytes,
        ),
        cost_estimate=cost,
    )(x2, scale2, shift2)

    # TODO(synk): for D < 128 the store is a masked (lane-sparse) vst; a
    # lane-dense repack (folding rows into the lane axis) was skipped since
    # real GPT emb_dims (768/4096) are already multiples of 128.
    return out.reshape(orig_shape)


def _reference_layer_norm(x, scale, shift, eps=1e-5):
    xf = x.astype(jnp.float32)
    mean = jnp.mean(xf, axis=-1, keepdims=True)
    var = jnp.mean((xf - mean) ** 2, axis=-1, keepdims=True)  # unbiased=False
    y = (xf - mean) / jnp.sqrt(var + eps) * scale.astype(jnp.float32) \
        + shift.astype(jnp.float32)
    return y.astype(x.dtype)


if __name__ == "__main__":
    key = jax.random.PRNGKey(0)
    batch, seq, emb_dim = 2, 8, 32
    x = jax.random.normal(key, (batch, seq, emb_dim), dtype=jnp.float32)

    # nn.Parameter(torch.ones(emb_dim)) / torch.zeros(emb_dim)
    scale = jnp.ones((emb_dim,), dtype=jnp.float32)
    shift = jnp.zeros((emb_dim,), dtype=jnp.float32)

    out = layer_norm(x, scale, shift, eps=1e-5)
    out = jax.block_until_ready(out)

    ref = _reference_layer_norm(x, scale, shift, eps=1e-5)
    assert out.shape == x.shape and out.dtype == x.dtype
    assert jnp.allclose(out, ref, atol=1e-5, rtol=1e-5)

    # Ragged-grid check: rows (= 4*5 = 20) not a multiple of row_tile (= 8),
    # exercising the masked last block (no host pad / slice).
    x_r = jax.random.normal(jax.random.PRNGKey(1), (4, 5, emb_dim),
                            dtype=jnp.float32)
    out_r = jax.block_until_ready(layer_norm(x_r, scale, shift, row_tile=8))
    ref_r = _reference_layer_norm(x_r, scale, shift)
    assert jnp.allclose(out_r, ref_r, atol=1e-5, rtol=1e-5)

    # bf16 smoke test: exercises the reduced-precision epilogue path
    # (f32 reductions, bf16 elementwise tail). Loose tolerance for bf16.
    x_b = jax.random.normal(jax.random.PRNGKey(2), (batch, seq, emb_dim),
                            dtype=jnp.bfloat16)
    out_b = jax.block_until_ready(
        layer_norm(x_b, scale.astype(jnp.bfloat16), shift.astype(jnp.bfloat16)))
    ref_b = _reference_layer_norm(x_b, scale, shift)
    assert out_b.shape == x_b.shape and out_b.dtype == x_b.dtype
    assert jnp.allclose(out_b.astype(jnp.float32), ref_b.astype(jnp.float32),
                        atol=1e-1, rtol=1e-1)

    print("KERNEL_OK")
</pallas_src>

<mosaic_0001>
module attributes {stable_mosaic.version = 11 : i64} {
  func.func @_layernorm_kernel(%arg0: i32, %arg1: memref<8x32xf32, #tpu.memory_space<vmem>>, %arg2: memref<1x32xf32, #tpu.memory_space<vmem>>, %arg3: memref<1x32xf32, #tpu.memory_space<vmem>>, %arg4: memref<8x32xf32, #tpu.memory_space<vmem>>) attributes {dimension_semantics = [#tpu.dimension_semantics<parallel>], iteration_bounds = array<i64: 2>, scalar_prefetch = 0 : i64, scratch_operands = 0 : i64, tpu.core_type = #tpu.core_type<tc>, window_params = [{transform_indices = @transform_0, window_bounds = array<i64: 8, 32>}, {pipeline_mode = #tpu.pipeline_mode<synchronous>, transform_indices = @transform_1, window_bounds = array<i64: 1, 32>}, {pipeline_mode = #tpu.pipeline_mode<synchronous>, transform_indices = @transform_2, window_bounds = array<i64: 1, 32>}, {transform_indices = @transform_3, window_bounds = array<i64: 8, 32>}]} {
    %c0 = arith.constant 0 : index
    %c0_0 = arith.constant 0 : index
    %0 = vector.load %arg1[%c0, %c0_0] : memref<8x32xf32, #tpu.memory_space<vmem>>, vector<8x32xf32>
    %cst = arith.constant dense<0.000000e+00> : vector<8xf32>
    %1 = vector.multi_reduction <add>, %0, %cst [1] : vector<8x32xf32> to vector<8xf32>
    %2 = vector.shape_cast %1 : vector<8xf32> to vector<8x1xf32>
    %cst_1 = arith.constant 3.200000e+01 : f32
    %3 = vector.broadcast %cst_1 : f32 to vector<8x1xf32>
    %4 = arith.divf %2, %3 : vector<8x1xf32>
    %5 = arith.mulf %0, %0 : vector<8x32xf32>
    %cst_2 = arith.constant dense<0.000000e+00> : vector<8xf32>
    %6 = vector.multi_reduction <add>, %5, %cst_2 [1] : vector<8x32xf32> to vector<8xf32>
    %7 = vector.shape_cast %6 : vector<8xf32> to vector<8x1xf32>
    %cst_3 = arith.constant 3.200000e+01 : f32
    %8 = vector.broadcast %cst_3 : f32 to vector<8x1xf32>
    %9 = arith.divf %7, %8 : vector<8x1xf32>
    %10 = arith.mulf %4, %4 : vector<8x1xf32>
    %11 = arith.subf %9, %10 : vector<8x1xf32>
    %cst_4 = arith.constant 0.000000e+00 : f32
    %12 = vector.broadcast %cst_4 : f32 to vector<8x1xf32>
    %13 = arith.maximumf %11, %12 : vector<8x1xf32>
    %cst_5 = arith.constant 9.99999974E-6 : f32
    %14 = vector.broadcast %cst_5 : f32 to vector<8x1xf32>
    %15 = arith.addf %13, %14 : vector<8x1xf32>
    %16 = math.rsqrt %15 : vector<8x1xf32>
    %17 = vector.broadcast %4 : vector<8x1xf32> to vector<8x32xf32>
    %18 = arith.subf %0, %17 : vector<8x32xf32>
    %19 = vector.broadcast %16 : vector<8x1xf32> to vector<8x32xf32>
    %20 = arith.mulf %18, %19 : vector<8x32xf32>
    %c0_6 = arith.constant 0 : index
    %c0_7 = arith.constant 0 : index
    %21 = vector.load %arg2[%c0_6, %c0_7] : memref<1x32xf32, #tpu.memory_space<vmem>>, vector<1x32xf32>
    %22 = vector.broadcast %21 : vector<1x32xf32> to vector<8x32xf32>
    %23 = arith.mulf %20, %22 : vector<8x32xf32>
    %c0_8 = arith.constant 0 : index
    %c0_9 = arith.constant 0 : index
    %24 = vector.load %arg3[%c0_8, %c0_9] : memref<1x32xf32, #tpu.memory_space<vmem>>, vector<1x32xf32>
    %25 = vector.broadcast %24 : vector<1x32xf32> to vector<8x32xf32>
    %26 = arith.addf %23, %25 : vector<8x32xf32>
    %c0_10 = arith.constant 0 : index
    %c0_11 = arith.constant 0 : index
    %27 = vector.load %arg4[%c0_10, %c0_11] : memref<8x32xf32, #tpu.memory_space<vmem>>, vector<8x32xf32>
    tpu.vector_store %arg4[%c0_10, %c0_11], %26 {strides = array<i32>} : memref<8x32xf32, #tpu.memory_space<vmem>>, vector<8x32xf32>,
    return
  }
  func.func @transform_0(%arg0: i32) -> (i32, i32) {
    %c0_i32 = arith.constant 0 : i32
    %c0_i32_0 = arith.constant 0 : i32
    return %arg0, %c0_i32 : i32, i32
  }
  func.func @transform_1(%arg0: i32) -> (i32, i32) {
    %c0_i32 = arith.constant 0 : i32
    %c0_i32_0 = arith.constant 0 : i32
    %c0_i32_1 = arith.constant 0 : i32
    return %c0_i32, %c0_i32_0 : i32, i32
  }
  func.func @transform_2(%arg0: i32) -> (i32, i32) {
    %c0_i32 = arith.constant 0 : i32
    %c0_i32_0 = arith.constant 0 : i32
    %c0_i32_1 = arith.constant 0 : i32
    return %c0_i32, %c0_i32_0 : i32, i32
  }
  func.func @transform_3(%arg0: i32) -> (i32, i32) {
    %c0_i32 = arith.constant 0 : i32
    %c0_i32_0 = arith.constant 0 : i32
    return %arg0, %c0_i32 : i32, i32
  }
}

</mosaic_0001>

<bundles_post_ra>
// kernel: tpu_custom_call.1
= control target key start
LH: loop header
LB: loop body
LE: loop exit
PB: predicated region body
PF: predicated region fallthrough
CT: control target
= control target key end

     0   :  { %8 = vsyncpa [#allocation3], 0  ;;  %s658_s0 = inlined_call_operand.hbm [shape: f32[16,32], index: 0, kind: input, shape index: {}]   ;;  %s659_s1 = inlined_call_operand.vmem [shape: f32[1,32], index: 1, kind: input, shape index: {}]   ;;  %s660_s2 = inlined_call_operand.vmem [shape: f32[1,32], index: 2, kind: input, shape index: {}]   ;;  %s661_s3 = inlined_call_operand.hbm [shape: f32[16,32], index: 3, kind: output, shape index: {}]  }
   0x1   :  { %10 = vsyncpa [#allocation3 + $0x1], 0 }
   0x2   :  { %11 = vsyncpa [#allocation4], 0 }
   0x3   :  { %13 = vsyncpa [#allocation4 + $0x1], 0  ;;  %s488_s12 = smov 0   ;;  %s490_s13 = smov 0  }
   0x4   :  { %s492_s14 = smov 0   ;;  %s494_s15 = smov 0  }
   0x5 LB: > { %s509_s16 = sadd.s32 4294967295, %s464_s15   ;;  %s306_s17 = sadd.s32 4294967294, %s464_s15   ;;  %s464_s15 = sphi %s494_s15, %s676_s15   ;;  %s460_s14 = sphi %s492_s14, %s675_s14   ;;  %s456_s13 = sphi %s490_s13, %s674_s13   ;;  %s452_s12 = sphi %s488_s12, %s673_s12  }
   0x6   : > { %s513_s18 = sadd.s32 1, %s464_s15   ;;  %s26_s19 = sadd.s32 1, %s460_s14 }
   0x7   : > { %s23_s20 = ssub.s32 %s464_s15, %s513_s18  ;;  %p33_p0 = scmp.ne.s32.totalorder %s460_s14, %s456_s13 }
   0x8   : > { %p24_p1 = scmp.eq.s32.totalorder %s23_s20, 0  ;;  %p34_p2 = scmp.eq.s32.totalorder %s464_s15, 0 }
   0x9   : > { %p39_p3 = scmp.ne.s32.totalorder %s456_s13, %s452_s12  ;;  %p40_p4 = scmp.eq.s32.totalorder %s509_s16, 0 }
   0xa   : > { %s525_s21 = scalar_select %p24_p1, %s460_s14, %s26_s19  }
   0xb   : > { %p527_p5 = por %p34_p2, %p33_p0  ;;  %p531_p6 = por %p40_p4, %p39_p3 }
   0xc   : > { %p105_p7 = scmp.eq.s32.totalorder %s509_s16, 1  ;;  %p111_p8 = scmp.eq.s32.totalorder %s306_s17, 1 }
   0xd   : > { %p332_p10 = scmp.lt.s32.totalorder %s464_s15, 2  ;;  %s137_s26 = sand.u32 1, %s460_s14  }
   0xe   : > { %p538_p11 = por %p105_p7, %p33_p0  ;;  %p542_p12 = por %p111_p8, %p39_p3 }
   0xf   : > { %s310_s27 = sshll.u32 %s464_s15, 7  ;;  %s309_s28 = sshll.u32 %s137_s26, 3 }
  0x10   : > { %s665_s24 = scalar_select %p538_p11, 1, 0 }
  0x11   : > { %s666_s25 = scalar_select %p542_p12, 1, 0 }
  0x12   : > { %s551_s4 = scalar_lea.hbm %s658_s0, %s310_s27  ;;  %s141_s5 = scalar_lea.vmem [#allocation2], %s309_s28 }
  0x13   : > { %s148_s6 = sshll.u32 %s141_s5, 4  ;;  %p555_p13 = pnand %p332_p10, %p527_p5  ;;  %s559_s6 = int_to_ptr.vmem [resolvable:$true] %s148_s6 }
  0x14   : > { %s138_s8 = scalar_lea.sflag [#allocation3], %s137_s26  ;;  %s368_s9 = scalar_lea.hbm %s551_s4, 128 }
  0x15   : > { %p369_p2 = scmp.ne.s32.totalorder %s551_s4, %s368_s9  ;;  %p370_p3 = pneg %p555_p13 }
  0x16   : > { %s373_s17 = scalar_lea.hbm %s658_s0, 256  ;;  %p374_p5 = scmp.lt.u32.totalorder %s551_s4, %s658_s0 }
  0x17   : > { %p371_p4 = pnand %p370_p3, %p369_p2  ;;  %p375_p8 = scmp.lt.u32.totalorder %s373_s17, %s368_s9 }
  0x18   : > { %p377_p9 = scmp.lt.u32.totalorder %s368_s9, %s551_s4 }
  0x19   : > { %p372_p7 = pneg %p371_p4  ;;  %p376_p10 = por %p375_p8, %p374_p5 }
  0x1b   : > { %p378_p0 = por %p377_p9, %p376_p10 }
  0x1d   : > { %p379_p1 = pnand %p378_p0, %p372_p7 }
  0x1f   : > { %382 = shalt.err (!%p379_p1)
}
  0x20   : > { %s383_s22 = scalar_lea.vmem %s559_s6, 128  ;;  %s466_s26 = smov [#allocation2]  }
  0x21   : > { %p384_p2 = scmp.ne.s32.totalorder %s559_s6, %s383_s22  ;;  %s388_s27 = sshll.u32 %s466_s26, 4  ;;  %s389_s27 = int_to_ptr.vmem [resolvable:$false] %s388_s27 }
  0x22   : > { %s390_s28 = scalar_lea.vmem %s389_s27, 256  ;;  %p391_p11 = scmp.lt.s32.totalorder %s559_s6, %s389_s27 }
  0x23   : > { %p386_p4 = pnand %p384_p2, %p370_p3  ;;  %p392_p5 = scmp.lt.s32.totalorder %s390_s28, %s383_s22 }
  0x25   : > { %p387_p12 = pneg %p386_p4  ;;  %p393_p8 = por %p392_p5, %p391_p11 }
  0x27   : > { %p394_p9 = pnand %p393_p8, %p387_p12 }
  0x29   : > { %397 = shalt.err (!%p394_p9)
}
  0x2a   : > { %327 = dma.hbm_to_vmem [thread:$0]  (!%p555_p13), %s551_s4, 128, %s559_s6, %s138_s8  }
  0x2b   : > { %p668_p0 = scmp.lt.s32.totalorder %s464_s15, 3  ;;  %p669_p1 = scmp.ge.s32.totalorder %s464_s15, 1 }
  0x2d   : > { %p154_p3 = pnand %p669_p1, %p668_p0 }
  0x2e   : > { %s593_s29 = sand.u32 (!%p154_p3), 1, %s456_s13  }
  0x2f   : > { %157 = sbr.rel (%p154_p3) target bundleno = 242 (0xf2), region = 32  ;;  %s312_s30 = sshll.u32 (!%p154_p3), %s593_s29, 3 }
  0x30   : > { %s160_s5 = scalar_lea.sflag (!%p154_p3), [#allocation3], %s593_s29  ;;  %s163_s9 = scalar_lea.vmem (!%p154_p3), [#allocation2], %s312_s30 }
  0x36   : > { %443 = dma.done.wait (%p531_p6), %s160_s5, 128  }
  0x37   : > { %445 = vsyncadd (%p531_p6), %s160_s5, 4294967168  ;;  %vm187_vm0 = vcmask 261120   ;;  %v186_v0 = vld [vmem:[%s163_s9] sm:$0xff]  ;;  %s317_s8 = sshll.u32 %s509_s16, 7  ;;  %s185_s10 = scalar_lea.vmem [#allocation5], %s312_s30 }
  0x38   : > { %v188_v1 = vsel %vm187_vm0, %v186_v0, 0.0  ;;  %v193_v2 = vmul.f32 %v186_v0, %v186_v0  ;;  %v314_v14 = vld [vmem:[%s659_s1] ss:$0 sm:$0xff]  ;;  %s236_s11 = sshll.u32 %s185_s10, 4  ;;  %s613_s20 = scalar_lea.hbm %s661_s3, %s317_s8  ;;  %s615_s11 = int_to_ptr.vmem [resolvable:$true] %s236_s11 }
  0x39   : > { %189 = vadd.xlane.f32.xlu0 %v188_v1  ;;  %v315_v16 = vld [vmem:[%s660_s2] ss:$0 sm:$0xff]  ;;  %s223_s22 = scalar_lea.sflag [#allocation4], %s593_s29  ;;  %s398_s26 = scalar_lea.vmem %s615_s11, 128 }
  0x3a   : > { %v194_v3 = vsel %vm187_vm0, %v193_v2, 0.0  ;;  %p399_p6 = scmp.ne.s32.totalorder %s615_s11, %s398_s26  ;;  %p670_p11 = scmp.ne.s32.totalorder %s665_s24, 0 }
  0x3b   : > { %s467_s16 = smov [#allocation5]  }
  0x3c   : > { %p400_p12 = pnand %p399_p6, %p670_p11  ;;  %s402_s27 = sshll.u32 %s467_s16, 4  ;;  %s403_s27 = int_to_ptr.vmem [resolvable:$false] %s402_s27 }
  0x3d   : > { %195 = vadd.xlane.f32.xlu0 %v194_v3  ;;  %s404_s28 = scalar_lea.vmem %s403_s27, 256  ;;  %p405_p7 = scmp.lt.s32.totalorder %s615_s11, %s403_s27 }
  0x3e   : > { %p401_p13 = pneg %p400_p12  ;;  %p406_p10 = scmp.lt.s32.totalorder %s404_s28, %s398_s26 }
  0x40   : > { %p407_p2 = por %p406_p10, %p405_p7 }
  0x42   : > { %p408_p4 = pnand %p407_p2, %p401_p13 }
  0xc6   : > { %v190_v4 = vpop.xlane.xlu0 %189 }
  0xc7   : > { %v192_v5 = vmul.f32 0.03125, %v190_v4 }
  0xc9   : > { %v198_v7 = vmul.f32 %v192_v5, %v192_v5  ;;  %v203_v12 = vsub.f32 %v186_v0, %v192_v5 }
  0xca   : > { %v196_v6 = vpop.xlane.xlu0 %195 }
  0xcb   : > { %v197_v8 = vmul.f32 0.03125, %v196_v6 }
  0xcd   : > { %v199_v9 = vsub.f32 %v197_v8, %v198_v7 }
  0xcf   : > { %v200_v10 = vmax.f32 %v199_v9, 0.0 }
  0xd1   : > { %v201_v11 = vadd.f32 1e-05, %v200_v10 }
  0xd3   : > { %366 = vrsqrt.f32 %v201_v11 }
  0xdd   : > { %v367_v13 = vpop.eup %366 }
  0xde   : > { %v204_v15 = vmul.f32 %v367_v13, %v203_v12 }
  0xe0   : > { %v212_v17 = vmul.f32 %v314_v14, %v204_v15 }
  0xe2   : > { %v220_v18 = vadd.f32 %v315_v16, %v212_v17 }
  0xe4   : > { %221 = vst.msk [vmem:[%s185_s10] sm:$0xff] %vm187_vm0, %v220_v18 }
  0xe5   : > { %411 = shalt.err (!%p408_p4)
}
  0xe6   : > { %s412_s29 = scalar_lea.hbm %s613_s20, 128  ;;  %s416_s9 = scalar_lea.hbm %s661_s3, 256 }
  0xe7   : > { %p413_p5 = scmp.ne.s32.totalorder %s613_s20, %s412_s29  ;;  %p417_p0 = scmp.lt.u32.totalorder %s613_s20, %s661_s3 }
  0xe8   : > { %p418_p1 = scmp.lt.u32.totalorder %s416_s9, %s412_s29  ;;  %p420_p6 = scmp.lt.u32.totalorder %s412_s29, %s613_s20 }
  0xe9   : > { %p414_p8 = pnand %p413_p5, %p670_p11 }
  0xea   : > { %p419_p3 = por %p418_p1, %p417_p0 }
  0xeb   : > { %p415_p9 = pneg %p414_p8 }
  0xec   : > { %p421_p12 = por %p420_p6, %p419_p3 }
  0xee   : > { %p422_p13 = pnand %p421_p12, %p415_p9 }
  0xf0   : > { %425 = shalt.err (!%p422_p13)
}
  0xf1   : > { %322 = dma.vmem_to_hbm [thread:$0]  (%p670_p11), %s615_s11, 128, %s613_s20, %s223_s22  }
  0xf2 PF: > { %s248_s6 = sand.u32 1, %s452_s12   ;;  %p671_p7 = scmp.ne.s32.totalorder %s666_s25, 0 }
  0xf3   : > { %p672_p10 = scmp.ge.s32.totalorder %s464_s15, 2  ;;  %s249_s7 = scalar_lea.sflag [#allocation4], %s248_s6 }
  0xf5   : > { %p329_p2 = pnand %p672_p10, %p671_p7 }
  0xf7   : > { %447 = dma.done.wait (!%p329_p2), %s249_s7, 128  }
  0xf8   : > { %449 = vsyncadd (!%p329_p2), %s249_s7, 4294967168  ;;  %p16_p4 = scmp.ge.s32.totalorder %s513_s18, 4   ;;  %s673_s12 = smov %s456_s13 }
  0xf9   : > { %s674_s13 = smov %s460_s14  ;;  %s675_s14 = smov %s525_s21 }
  0xfa   : > { %s676_s15 = smov %s513_s18  ;;  %18 = sbr.rel (!%p16_p4) target bundleno = 5 (0x5), region = 77 }
 0x101   :  { %254 = vsyncpa [#allocation3], 1 }
 0x102   :  { %256 = vsyncpa [#allocation3 + $0x1], 1 }
 0x103   :  { %257 = vsyncpa [#allocation4], 1 }
 0x104   :  { %259 = vsyncpa [#allocation4 + $0x1], 1 }

</bundles_post_ra>
